<compile_context>
chip_gen: v6e
topology: v6e:2x2x1
jax: 0.10.0
libtpu: 0.0.40
codegen_flags: <defaults>
</compile_context>

<pallas_src>
import functools

import jax
import jax.numpy as jnp
from jax.experimental import pallas as pl
from jax.experimental.pallas import tpu as pltpu


def _round_up(n, m):
    return ((n + m - 1) // m) * m


def _tpu_info():
    """Best-effort chip detection. A wrong guess only costs perf, never correctness."""
    vmem_cap = 64 << 20        # conservative default (v7x per-TC VMEM)
    num_tc = 1                 # TensorCores reachable via "parallel" grid sharding
    bf16_vpu = True            # VPU/EUP supports bf16 elementwise/transcendentals
    try:
        kind = jax.devices()[0].device_kind.lower()
    except Exception:
        kind = ""
    if "v7" in kind:
        vmem_cap, num_tc, bf16_vpu = 64 << 20, 2, True
    elif "v6" in kind:
        vmem_cap, num_tc, bf16_vpu = 128 << 20, 1, True
    elif "v5" in kind and ("lite" in kind or "5e" in kind):
        vmem_cap, num_tc, bf16_vpu = 128 << 20, 1, False
    elif "v5" in kind or "v4" in kind:           # v5p / v4: megacore, no bf16 VPU/EUP
        vmem_cap, num_tc, bf16_vpu = 128 << 20, 2, False
    try:  # refine VMEM capacity if the query API is available; take min (stay safe)
        q = int(pltpu.get_tpu_info().vmem_capacity_bytes)
        if q > 0:
            vmem_cap = min(vmem_cap, q)
    except Exception:
        pass
    return vmem_cap, num_tc, bf16_vpu


def _critic_mlp_kernel(x_ref, w1_ref, w2_ref, aux_ref, out_ref, *,
                       use_relu: bool, act_dtype):
    act = jax.nn.relu if use_relu else jnp.tanh

    b1 = aux_ref[0:1, :]        # [1, H] f32
    b2 = aux_ref[1:2, :]        # [1, H] f32
    w3 = aux_ref[2:3, :]        # [1, H] f32 (fc3 weight as a row)
    b3 = aux_ref[3:4, 0:1]      # [1, 1] f32 (fc3 bias)

    # x is cast to the matmul-operand dtype in-kernel (removes a wrapper-side XLA op).
    x = x_ref[...].astype(w1_ref.dtype)                                 # [TB, D_in]
    h = jnp.dot(x, w1_ref[...], preferred_element_type=jnp.float32) + b1
    h = act(h.astype(act_dtype))                                        # bf16 act on v6e/v7x
    h = jnp.dot(h.astype(w2_ref.dtype), w2_ref[...],
                preferred_element_type=jnp.float32) + b2
    h = act(h.astype(act_dtype))                                        # [TB, H]

    # fc3 has a single output feature: VPU multiply + lane reduce instead of a
    # degenerate N=1 MXU matmul.
    v = jnp.sum(h.astype(jnp.float32) * w3, axis=-1)                    # [TB] f32
    # Lane-dense store: batch rides on the lane axis of the output block.
    out_ref[...] = (v[None, :] + b3).astype(out_ref.dtype)              # [1, TB]


def prepare_critic_params(params, compute_dtype=jnp.bfloat16):
    """One-time packing of PyTorch-style params into kernel-ready arrays.

    params: (w1, b1, w2, b2, w3, b3) with weights already transposed to [in, out].
    Returns (w1c, w2c, aux): matmul weights pre-cast to compute_dtype (bf16 default,
    f32 accumulation happens inside the kernel) and aux = [b1; b2; w3; b3] as (4, H) f32.
    """
    w1, b1, w2, b2, w3, b3 = params
    D_in, H = w1.shape
    assert w2.shape == (H, H) and w3.shape == (H, 1)
    aux = jnp.concatenate([
        jnp.reshape(b1, (1, H)).astype(jnp.float32),
        jnp.reshape(b2, (1, H)).astype(jnp.float32),
        jnp.reshape(w3, (1, H)).astype(jnp.float32),
        jnp.broadcast_to(jnp.reshape(jnp.asarray(b3, jnp.float32), (1, 1)), (1, H)),
    ], axis=0)
    return (w1.astype(compute_dtype), w2.astype(compute_dtype), aux)


_ALLOW_SINGLE_BUFFER = True   # auto-falls back if pl.Buffered(1) is rejected


def critic_mlp_forward(x, prepared_params, *, use_relu: bool = False, tile_rows=None):
    """x: [B, critic_input_dim]. prepared_params from prepare_critic_params.
    Returns value: [B, 1] float32."""
    global _ALLOW_SINGLE_BUFFER
    w1c, w2c, aux = prepared_params
    B, D_in = x.shape
    H = w1c.shape[1]
    assert w1c.shape == (D_in, H) and w2c.shape == (H, H) and aux.shape == (4, H)

    vmem_cap, num_tc, bf16_vpu = _tpu_info()
    vmem_limit = int(vmem_cap * 3 // 4)            # ~96 MiB v5e/v6e, ~48 MiB v7x
    w_isz = jnp.dtype(w1c.dtype).itemsize
    x_isz = jnp.dtype(x.dtype).itemsize

    # bf16 activations only where the VPU/EUP supports bf16 (v6e/v7x).
    act_dtype = w1c.dtype if (w_isz == 2 and bf16_vpu) else jnp.float32

    # --- batch tiling -------------------------------------------------------
    min_rows = 16 if w_isz == 2 else 8             # bf16 packs 16 rows per sublane tile
    if B >= 128:
        min_rows = max(min_rows, 128)              # unmasked lane-dense output stores
    if tile_rows is not None:
        tile_b = _round_up(max(int(tile_rows), 1), min_rows)
        num_tiles = -(-B // tile_b)
    else:
        # 1 grid step on single-TC chips (grid steps are a serial loop there);
        # num_tc steps on multi-TC chips so "parallel" can shard across cores.
        num_tiles = num_tc if (num_tc > 1 and B > min_rows) else 1
        budget = int(vmem_limit * 0.7)
        while True:
            tile_b = _round_up(-(-B // num_tiles), min_rows)
            resident = ((D_in * H + H * H) * w_isz + 4 * H * 4    # weights + aux (single-buffered)
                        + 2 * tile_b * D_in * x_isz               # double-buffered x tile
                        + 2 * tile_b * 4                          # double-buffered out row
                        + 4 * tile_b * H * 4)                     # f32 activation temporaries
            if resident <= budget or tile_b <= min_rows:
                break
            num_tiles *= 2
    # TODO(synk): for very large H (bf16 W2 approaching v7x's 64 MiB VMEM) stream W2 in
    # (H, tn) panels with an inner pltpu.emit_pipeline instead of keeping it resident.

    B_pad = num_tiles * tile_b
    if B_pad != B:
        x = jnp.pad(x, ((0, B_pad - B), (0, 0)))

    kernel = functools.partial(_critic_mlp_kernel, use_relu=use_relu, act_dtype=act_dtype)

    def _call(single_buffer_weights):
        # Grid-invariant operands never change across steps; single-buffering halves
        # their VMEM footprint (matters for large H on v7x's 64 MiB VMEM).
        wkw = {"pipeline_mode": pl.Buffered(1)} if single_buffer_weights else {}
        return pl.pallas_call(
            kernel,
            out_shape=jax.ShapeDtypeStruct((num_tiles, tile_b), jnp.float32),
            grid_spec=pl.GridSpec(
                grid=(num_tiles,),
                in_specs=[
                    pl.BlockSpec((tile_b, D_in), lambda i: (i, 0)),      # x tile
                    pl.BlockSpec((D_in, H), lambda i: (0, 0), **wkw),    # W1 (resident)
                    pl.BlockSpec((H, H), lambda i: (0, 0), **wkw),       # W2 (resident)
                    pl.BlockSpec((4, H), lambda i: (0, 0), **wkw),       # [b1; b2; w3; b3]
                ],
                out_specs=pl.BlockSpec((1, tile_b), lambda i: (i, 0)),   # lane-dense row
            ),
            compiler_params=pltpu.CompilerParams(
                dimension_semantics=("parallel",),
                vmem_limit_bytes=vmem_limit),
        )(x, w1c, w2c, aux)

    if _ALLOW_SINGLE_BUFFER:
        try:
            out = _call(True)
        except Exception:
            _ALLOW_SINGLE_BUFFER = False
            out = _call(False)
    else:
        out = _call(False)

    # (num_tiles, tile_b) row-major == batch order; back to [B, 1].
    return out.reshape(B_pad)[:B].reshape(B, 1)


def _orthogonal(key, shape, gain=1.0, dtype=jnp.float32):
    """Orthogonal init mirroring torch.nn.init.orthogonal_ semantics."""
    rows, cols = shape
    a = jax.random.normal(key, (max(rows, cols), min(rows, cols)), jnp.float32)
    q, r = jnp.linalg.qr(a)
    d = jnp.sign(jnp.diagonal(r))
    d = jnp.where(d == 0, 1.0, d)
    q = q * d[None, :]
    if rows < cols:
        q = q.T
    return (gain * q).astype(dtype)


def init_critic_mlp_params(key, critic_input_dim, hidden_dim):
    """Orthogonal weights (gain=1), zero biases — matches use_orthogonal_init.
    Weights are returned already transposed to [in, out]."""
    k1, k2, k3 = jax.random.split(key, 3)
    w1 = _orthogonal(k1, (hidden_dim, critic_input_dim)).T      # [D_in, H]
    w2 = _orthogonal(k2, (hidden_dim, hidden_dim)).T            # [H, H]
    w3 = _orthogonal(k3, (1, hidden_dim)).T                     # [H, 1]
    b1 = jnp.zeros((hidden_dim,), jnp.float32)
    b2 = jnp.zeros((hidden_dim,), jnp.float32)
    b3 = jnp.zeros((), jnp.float32)
    return (w1, b1, w2, b2, w3, b3)


def critic_mlp_reference(x, params, *, use_relu: bool = False):
    """Plain-JAX reference of the PyTorch forward pass."""
    act = jax.nn.relu if use_relu else jnp.tanh
    w1, b1, w2, b2, w3, b3 = params
    h = act(x @ w1 + b1)
    h = act(h @ w2 + b2)
    return h @ w3 + b3


if __name__ == "__main__":
    # args.mlp_hidden_dim = 32, critic_input_dim = 16, use_relu = 0 (Tanh),
    # use_orthogonal_init = True.  Batch = 64 (small RL rollout chunk).
    B, D_IN, HIDDEN = 64, 16, 32
    USE_RELU = False

    key = jax.random.PRNGKey(0)
    k_x, k_p = jax.random.split(key)
    x = jax.random.normal(k_x, (B, D_IN), dtype=jnp.float32)
    params = init_critic_mlp_params(k_p, D_IN, HIDDEN)
    ref = critic_mlp_reference(x, params, use_relu=USE_RELU)

    # Kernel-ready params built once (weight casts / aux packing hoisted out of the
    # per-call path).
    p_bf16 = prepare_critic_params(params, compute_dtype=jnp.bfloat16)   # default path
    p_f32 = prepare_critic_params(params, compute_dtype=jnp.float32)

    # 1) Default bf16-operand path (f32 accumulation), generation-aware grid.
    v_bf16 = jax.block_until_ready(critic_mlp_forward(x, p_bf16, use_relu=USE_RELU))
    assert v_bf16.shape == (B, 1)
    assert jnp.allclose(v_bf16, ref, atol=5e-2, rtol=5e-2), "bf16 mismatch vs reference"

    # 2) f32 path (tight tolerance).
    v_f32 = jax.block_until_ready(critic_mlp_forward(x, p_f32, use_relu=USE_RELU))
    assert v_f32.shape == (B, 1)
    assert jnp.allclose(v_f32, ref, atol=1e-5, rtol=1e-5), "f32 mismatch vs reference"

    # 3) Ragged batch: exercises zero-padding + slicing back.
    B_R = 50
    v_r = jax.block_until_ready(critic_mlp_forward(x[:B_R], p_f32, use_relu=USE_RELU))
    assert v_r.shape == (B_R, 1)
    assert jnp.allclose(v_r, ref[:B_R], atol=1e-5, rtol=1e-5), "ragged mismatch"

    # 4) Forced multi-step grid: exercises tiled x + lane-dense out path on any chip.
    v_t = jax.block_until_ready(
        critic_mlp_forward(x, p_f32, use_relu=USE_RELU, tile_rows=16))
    assert jnp.allclose(v_t, ref, atol=1e-5, rtol=1e-5), "multi-tile mismatch"

    # 5) ReLU activation variant (args.use_relu = 1 path).
    ref_relu = critic_mlp_reference(x, params, use_relu=True)
    v_relu = jax.block_until_ready(critic_mlp_forward(x, p_f32, use_relu=True))
    assert jnp.allclose(v_relu, ref_relu, atol=1e-5, rtol=1e-5), "relu mismatch"

    print("KERNEL_OK")
</pallas_src>

<mosaic_0001>
module attributes {stable_mosaic.version = 11 : i64} {
  func.func @_critic_mlp_kernel(%arg0: i32, %arg1: memref<64x16xf32, #tpu.memory_space<vmem>>, %arg2: memref<16x32xbf16, #tpu.memory_space<vmem>>, %arg3: memref<32x32xbf16, #tpu.memory_space<vmem>>, %arg4: memref<4x32xf32, #tpu.memory_space<vmem>>, %arg5: memref<1x64xf32, #tpu.memory_space<vmem>>) attributes {dimension_semantics = [#tpu.dimension_semantics<parallel>], iteration_bounds = array<i64: 1>, scalar_prefetch = 0 : i64, scratch_operands = 0 : i64, tpu.core_type = #tpu.core_type<tc>, window_params = [{transform_indices = @transform_0, window_bounds = array<i64: 64, 16>}, {pipeline_mode = #tpu.pipeline_mode<synchronous>, transform_indices = @transform_1, window_bounds = array<i64: 16, 32>}, {pipeline_mode = #tpu.pipeline_mode<synchronous>, transform_indices = @transform_2, window_bounds = array<i64: 32, 32>}, {pipeline_mode = #tpu.pipeline_mode<synchronous>, transform_indices = @transform_3, window_bounds = array<i64: 4, 32>}, {transform_indices = @transform_4, window_bounds = array<i64: 1, 64>}]} {
    %c0 = arith.constant 0 : index
    %c0_0 = arith.constant 0 : index
    %0 = vector.load %arg4[%c0, %c0_0] : memref<4x32xf32, #tpu.memory_space<vmem>>, vector<1x32xf32>
    %c1 = arith.constant 1 : index
    %c0_1 = arith.constant 0 : index
    %1 = vector.load %arg4[%c1, %c0_1] : memref<4x32xf32, #tpu.memory_space<vmem>>, vector<1x32xf32>
    %c2 = arith.constant 2 : index
    %c0_2 = arith.constant 0 : index
    %2 = vector.load %arg4[%c2, %c0_2] : memref<4x32xf32, #tpu.memory_space<vmem>>, vector<1x32xf32>
    %c3 = arith.constant 3 : index
    %c0_3 = arith.constant 0 : index
    %3 = vector.load %arg4[%c3, %c0_3] : memref<4x32xf32, #tpu.memory_space<vmem>>, vector<1x1xf32>
    %c0_4 = arith.constant 0 : index
    %c0_5 = arith.constant 0 : index
    %4 = vector.load %arg1[%c0_4, %c0_5] : memref<64x16xf32, #tpu.memory_space<vmem>>, vector<64x16xf32>
    %5 = arith.truncf %4 : vector<64x16xf32> to vector<64x16xbf16>
    %c0_6 = arith.constant 0 : index
    %c0_7 = arith.constant 0 : index
    %6 = vector.load %arg2[%c0_6, %c0_7] : memref<16x32xbf16, #tpu.memory_space<vmem>>, vector<16x32xbf16>
    %cst = arith.constant dense<0.000000e+00> : vector<64x32xf32>
    %7 = tpu.matmul %5, %6, %cst {dimension_numbers = #tpu.dot_dimension_numbers<[1], [0], [0], [1], [0, 0, 1, 1], [], []>} : vector<64x16xbf16>, vector<16x32xbf16>, vector<64x32xf32> -> vector<64x32xf32>
    %8 = vector.broadcast %0 : vector<1x32xf32> to vector<64x32xf32>
    %9 = arith.addf %7, %8 : vector<64x32xf32>
    %10 = arith.truncf %9 : vector<64x32xf32> to vector<64x32xbf16>
    %11 = math.tanh %10 : vector<64x32xbf16>
    %c0_8 = arith.constant 0 : index
    %c0_9 = arith.constant 0 : index
    %12 = vector.load %arg3[%c0_8, %c0_9] : memref<32x32xbf16, #tpu.memory_space<vmem>>, vector<32x32xbf16>
    %cst_10 = arith.constant dense<0.000000e+00> : vector<64x32xf32>
    %13 = tpu.matmul %11, %12, %cst_10 {dimension_numbers = #tpu.dot_dimension_numbers<[1], [0], [0], [1], [0, 0, 1, 1], [], []>} : vector<64x32xbf16>, vector<32x32xbf16>, vector<64x32xf32> -> vector<64x32xf32>
    %14 = vector.broadcast %1 : vector<1x32xf32> to vector<64x32xf32>
    %15 = arith.addf %13, %14 : vector<64x32xf32>
    %16 = arith.truncf %15 : vector<64x32xf32> to vector<64x32xbf16>
    %17 = math.tanh %16 : vector<64x32xbf16>
    %18 = arith.extf %17 : vector<64x32xbf16> to vector<64x32xf32>
    %19 = vector.broadcast %2 : vector<1x32xf32> to vector<64x32xf32>
    %20 = arith.mulf %18, %19 : vector<64x32xf32>
    %cst_11 = arith.constant dense<0.000000e+00> : vector<64xf32>
    %21 = vector.multi_reduction <add>, %20, %cst_11 [1] : vector<64x32xf32> to vector<64xf32>
    %22 = vector.shape_cast %21 : vector<64xf32> to vector<1x64xf32>
    %23 = vector.broadcast %3 : vector<1x1xf32> to vector<1x64xf32>
    %24 = arith.addf %22, %23 : vector<1x64xf32>
    %c0_12 = arith.constant 0 : index
    %c0_13 = arith.constant 0 : index
    %25 = vector.load %arg5[%c0_12, %c0_13] : memref<1x64xf32, #tpu.memory_space<vmem>>, vector<1x64xf32>
    tpu.vector_store %arg5[%c0_12, %c0_13], %24 {strides = array<i32>} : memref<1x64xf32, #tpu.memory_space<vmem>>, vector<1x64xf32>,
    return
  }
  func.func @transform_0(%arg0: i32) -> (i32, i32) {
    %c0_i32 = arith.constant 0 : i32
    %c0_i32_0 = arith.constant 0 : i32
    return %arg0, %c0_i32 : i32, i32
  }
  func.func @transform_1(%arg0: i32) -> (i32, i32) {
    %c0_i32 = arith.constant 0 : i32
    %c0_i32_0 = arith.constant 0 : i32
    %c0_i32_1 = arith.constant 0 : i32
    return %c0_i32, %c0_i32_0 : i32, i32
  }
  func.func @transform_2(%arg0: i32) -> (i32, i32) {
    %c0_i32 = arith.constant 0 : i32
    %c0_i32_0 = arith.constant 0 : i32
    %c0_i32_1 = arith.constant 0 : i32
    return %c0_i32, %c0_i32_0 : i32, i32
  }
  func.func @transform_3(%arg0: i32) -> (i32, i32) {
    %c0_i32 = arith.constant 0 : i32
    %c0_i32_0 = arith.constant 0 : i32
    %c0_i32_1 = arith.constant 0 : i32
    return %c0_i32, %c0_i32_0 : i32, i32
  }
  func.func @transform_4(%arg0: i32) -> (i32, i32) {
    %c0_i32 = arith.constant 0 : i32
    %c0_i32_0 = arith.constant 0 : i32
    return %arg0, %c0_i32 : i32, i32
  }
}

module attributes {stable_mosaic.version = 11 : i64} {
  func.func @_critic_mlp_kernel(%arg0: i32, %arg1: memref<64x16xf32, #tpu.memory_space<vmem>>, %arg2: memref<16x32xbf16, #tpu.memory_space<vmem>>, %arg3: memref<32x32xbf16, #tpu.memory_space<vmem>>, %arg4: memref<4x32xf32, #tpu.memory_space<vmem>>, %arg5: memref<1x64xf32, #tpu.memory_space<vmem>>) attributes {dimension_semantics = [#tpu.dimension_semantics<parallel>], iteration_bounds = array<i64: 1>, scalar_prefetch = 0 : i64, scratch_operands = 0 : i64, tpu.core_type = #tpu.core_type<tc>, window_params = [{transform_indices = @transform_0, window_bounds = array<i64: 64, 16>}, {pipeline_mode = #tpu.pipeline_mode<synchronous>, transform_indices = @transform_1, window_bounds = array<i64: 16, 32>}, {pipeline_mode = #tpu.pipeline_mode<synchronous>, transform_indices = @transform_2, window_bounds = array<i64: 32, 32>}, {pipeline_mode = #tpu.pipeline_mode<synchronous>, transform_indices = @transform_3, window_bounds = array<i64: 4, 32>}, {transform_indices = @transform_4, window_bounds = array<i64: 1, 64>}]} {
    %c0 = arith.constant 0 : index
    %c0_0 = arith.constant 0 : index
    %0 = vector.load %arg4[%c0, %c0_0] : memref<4x32xf32, #tpu.memory_space<vmem>>, vector<1x32xf32>
    %c1 = arith.constant 1 : index
    %c0_1 = arith.constant 0 : index
    %1 = vector.load %arg4[%c1, %c0_1] : memref<4x32xf32, #tpu.memory_space<vmem>>, vector<1x32xf32>
    %c2 = arith.constant 2 : index
    %c0_2 = arith.constant 0 : index
    %2 = vector.load %arg4[%c2, %c0_2] : memref<4x32xf32, #tpu.memory_space<vmem>>, vector<1x32xf32>
    %c3 = arith.constant 3 : index
    %c0_3 = arith.constant 0 : index
    %3 = vector.load %arg4[%c3, %c0_3] : memref<4x32xf32, #tpu.memory_space<vmem>>, vector<1x1xf32>
    %c0_4 = arith.constant 0 : index
    %c0_5 = arith.constant 0 : index
    %4 = vector.load %arg1[%c0_4, %c0_5] : memref<64x16xf32, #tpu.memory_space<vmem>>, vector<64x16xf32>
    %5 = arith.truncf %4 : vector<64x16xf32> to vector<64x16xbf16>
    %c0_6 = arith.constant 0 : index
    %c0_7 = arith.constant 0 : index
    %6 = vector.load %arg2[%c0_6, %c0_7] : memref<16x32xbf16, #tpu.memory_space<vmem>>, vector<16x32xbf16>
    %cst = arith.constant dense<0.000000e+00> : vector<64x32xf32>
    %7 = tpu.matmul %5, %6, %cst {dimension_numbers = #tpu.dot_dimension_numbers<[1], [0], [0], [1], [0, 0, 1, 1], [], []>} : vector<64x16xbf16>, vector<16x32xbf16>, vector<64x32xf32> -> vector<64x32xf32>
    %8 = vector.broadcast %0 : vector<1x32xf32> to vector<64x32xf32>
    %9 = arith.addf %7, %8 : vector<64x32xf32>
    %10 = arith.truncf %9 : vector<64x32xf32> to vector<64x32xbf16>
    %11 = math.tanh %10 : vector<64x32xbf16>
    %c0_8 = arith.constant 0 : index
    %c0_9 = arith.constant 0 : index
    %12 = vector.load %arg3[%c0_8, %c0_9] : memref<32x32xbf16, #tpu.memory_space<vmem>>, vector<32x32xbf16>
    %cst_10 = arith.constant dense<0.000000e+00> : vector<64x32xf32>
    %13 = tpu.matmul %11, %12, %cst_10 {dimension_numbers = #tpu.dot_dimension_numbers<[1], [0], [0], [1], [0, 0, 1, 1], [], []>} : vector<64x32xbf16>, vector<32x32xbf16>, vector<64x32xf32> -> vector<64x32xf32>
    %14 = vector.broadcast %1 : vector<1x32xf32> to vector<64x32xf32>
    %15 = arith.addf %13, %14 : vector<64x32xf32>
    %16 = arith.truncf %15 : vector<64x32xf32> to vector<64x32xbf16>
    %17 = math.tanh %16 : vector<64x32xbf16>
    %18 = arith.extf %17 : vector<64x32xbf16> to vector<64x32xf32>
    %19 = vector.broadcast %2 : vector<1x32xf32> to vector<64x32xf32>
    %20 = arith.mulf %18, %19 : vector<64x32xf32>
    %cst_11 = arith.constant dense<0.000000e+00> : vector<64xf32>
    %21 = vector.multi_reduction <add>, %20, %cst_11 [1] : vector<64x32xf32> to vector<64xf32>
    %22 = vector.shape_cast %21 : vector<64xf32> to vector<1x64xf32>
    %23 = vector.broadcast %3 : vector<1x1xf32> to vector<1x64xf32>
    %24 = arith.addf %22, %23 : vector<1x64xf32>
    %c0_12 = arith.constant 0 : index
    %c0_13 = arith.constant 0 : index
    %25 = vector.load %arg5[%c0_12, %c0_13] : memref<1x64xf32, #tpu.memory_space<vmem>>, vector<1x64xf32>
    tpu.vector_store %arg5[%c0_12, %c0_13], %24 {strides = array<i32>} : memref<1x64xf32, #tpu.memory_space<vmem>>, vector<1x64xf32>,
    return
  }
  func.func @transform_0(%arg0: i32) -> (i32, i32) {
    %c0_i32 = arith.constant 0 : i32
    %c0_i32_0 = arith.constant 0 : i32
    return %arg0, %c0_i32 : i32, i32
  }
  func.func @transform_1(%arg0: i32) -> (i32, i32) {
    %c0_i32 = arith.constant 0 : i32
    %c0_i32_0 = arith.constant 0 : i32
    %c0_i32_1 = arith.constant 0 : i32
    return %c0_i32, %c0_i32_0 : i32, i32
  }
  func.func @transform_2(%arg0: i32) -> (i32, i32) {
    %c0_i32 = arith.constant 0 : i32
    %c0_i32_0 = arith.constant 0 : i32
    %c0_i32_1 = arith.constant 0 : i32
    return %c0_i32, %c0_i32_0 : i32, i32
  }
  func.func @transform_3(%arg0: i32) -> (i32, i32) {
    %c0_i32 = arith.constant 0 : i32
    %c0_i32_0 = arith.constant 0 : i32
    %c0_i32_1 = arith.constant 0 : i32
    return %c0_i32, %c0_i32_0 : i32, i32
  }
  func.func @transform_4(%arg0: i32) -> (i32, i32) {
    %c0_i32 = arith.constant 0 : i32
    %c0_i32_0 = arith.constant 0 : i32
    return %arg0, %c0_i32 : i32, i32
  }
}

</mosaic_0001>

<bundles_post_ra>
// kernel: tpu_custom_call.1
= control target key start
LH: loop header
LB: loop body
LE: loop exit
PB: predicated region body
PF: predicated region fallthrough
CT: control target
= control target key end

     0   :  { %vm47_vm0 = vcmask 130048   ;;  %s598_s0 = inlined_call_operand.vmem [shape: f32[64,16], index: 0, kind: input, shape index: {}]   ;;  %s599_s1 = inlined_call_operand.vmem [shape: bf16[16,32], index: 1, kind: input, shape index: {}]   ;;  %s600_s2 = inlined_call_operand.vmem [shape: bf16[32,32], index: 2, kind: input, shape index: {}]   ;;  %s601_s3 = inlined_call_operand.vmem [shape: f32[4,32], index: 3, kind: input, shape index: {}]   ;;  %s602_s4 = inlined_call_operand.hbm [shape: f32[1,64], index: 4, kind: output, shape index: {}]  }
   0x1   :  { %v455_v0 = vld [vmem:[%s599_s1] sm:$0xff]   ;;  %v24_v2 = vld [vmem:[%s598_s0 + $0x8] sm:$0xff]  ;;  %v25_v3 = vld [vmem:[%s598_s0 + $0x10] sm:$0xff] }
   0x2   :  { %v23_v1 = vld [vmem:[%s598_s0] sm:$0xff]  ;;  %429 = vmatprep.subr.bf16.mxu0 %v455_v0  ;;  %v26_v5 = vld [vmem:[%s598_s0 + $0x18] sm:$0xff]  ;;  %v28_v7 = vld [vmem:[%s598_s0 + $0x28] sm:$0xff] }
   0x3   :  { %v31_v4 = vpack.c.bf16 %v24_v2, %v23_v1  ;;  %v27_v6 = vld [vmem:[%s598_s0 + $0x20] sm:$0xff]  ;;  %430 = vmatpush3.bf16.msra.mxu0 %v455_v0  ;;  %v32_v8 = vpack.c.bf16 %v26_v5, %v25_v3 }
   0x4   :  { %v33_v9 = vpack.c.bf16 %v28_v7, %v27_v6 }
   0x5   :  { %431 = vmatprep.mubr.msk.bf16.mxu0 %vm47_vm0, %v31_v4 }
   0x6   :  { %9 = vsyncpa [#allocation3], 0  ;;  %432 = vmatmul.mubr.msk.bf16.vlgmr.msra.gmra.mxu0 %vm47_vm0, %v32_v8  ;;  %v29_v10 = vld [vmem:[%s598_s0 + $0x30] sm:$0xff]  ;;  %v30_v11 = vld [vmem:[%s598_s0 + $0x38] sm:$0xff]  ;;  %vm153_vm1 = vcmask 261120   ;;  %v496_v40 = vmov 0  }
   0x7   :  { %435 = vmatprep.mubr.msk.bf16.mxu0 %vm47_vm0, %v33_v9  ;;  %v34_v12 = vpack.c.bf16 %v30_v11, %v29_v10  ;;  %v456_v13 = vld [vmem:[%s600_s2 + $0x8] sm:$0xff]   ;;  %v457_v14 = vld [vmem:[%s600_s2] sm:$0xff]   ;;  %453 = vset.pattern.permute.xlu1 %v496_v40  ;;  %vm343_vm2 = vcmask 130112   ;;  %vm350_vm3 = vcmask 195712   ;;  %vm357_vm4 = vcmask 261312  }
   0x8   :  { %439 = vmatprep.subr.bf16.mxu1 %v456_v13  ;;  %v404_v17 = vld [vmem:[%s601_s3] ss:$0 sm:$0xff]  ;;  %454 = vset.pattern.permute.xlu0 %v496_v40  ;;  %v410_v42 = vld [vmem:[%s601_s3 + $0x1] ss:$0 sm:$0xff]  ;;  %v417_v63 = vld [vmem:[%s601_s3 + $0x2] ss:$0 sm:$0xff] }
   0x9   :  { %440 = vmatpush3.bf16.msra.mxu1 %v456_v13  ;;  %vm364_vm5 = vcmask 326912   ;;  %vm371_vm6 = vcmask 392512   ;;  %vm378_vm7 = vcmask 458112   ;;  %vm385_vm8 = vcmask 523712  }
   0xa   :  { %441 = vmatprep.subr.bf16.mxu1 %v457_v14  ;;  %vm388_vm9 = vcmask 516096  }
   0xd   :  { %442 = vmatpush3.bf16.msra.mxu1 %v457_v14 }
   0xe   :  { %436 = vmatmul.mubr.msk.bf16.gmra.mxu0 %vm47_vm0, %v34_v12 }
  0xc6   :  { %v433_v15 = vpop.f32.mrf.mxu0 }
  0xc7   :  { %v103_v20 = vadd.f32 %v433_v15, %v404_v17 }
  0xc8   :  { %v94_v16 = vpop.f32.mrf.mxu0 }
  0xc9   :  { %v95_v22 = vadd.f32 %v404_v17, %v94_v16 }
  0xca   :  { %v434_v18 = vpop.f32.mrf.mxu0 }
  0xcb   :  { %v106_v19 = vadd.f32 %v434_v18, %v404_v17 }
  0xcc   :  { %v97_v21 = vpop.f32.mrf.mxu0 }
  0xcd   :  { %v98_v23 = vadd.f32 %v404_v17, %v97_v21  ;;  %v126_v24 = vpack.c.bf16 %v106_v19, %v103_v20 }
  0xce   :  { %v437_v25 = vpop.f32.mrf.mxu0 }
  0xcf   :  { %v125_v26 = vpack.c.bf16 %v98_v23, %v95_v22  ;;  %v119_v30 = vadd.f32 %v437_v25, %v404_v17 }
  0xd0   :  { %v110_v27 = vpop.f32.mrf.mxu0 }
  0xd1   :  { %458 = vtanh.bf16 %v125_v26  ;;  %v111_v32 = vadd.f32 %v404_v17, %v110_v27  ;;  %v22_v27 = vld [vmem:[%s601_s3 + $0x3] sm:$0x1]  ;;  %s497_s3 = smov [#allocation2]  }
  0xd2   :  { %460 = vtanh.bf16 %v126_v24  ;;  %v438_v28 = vpop.f32.mrf.mxu0  ;;  %s396_s16 = sshll.u32 %s497_s3, 4  ;;  %s397_s16 = int_to_ptr.vmem [resolvable:$true] %s396_s16 }
  0xd3   :  { %v122_v29 = vadd.f32 %v438_v28, %v404_v17  ;;  %s474_s17 = scalar_lea.vmem %s397_s16, 16  ;;  %s478_s18 = scalar_lea.vmem %s397_s16, 32 }
  0xd4   :  { %v113_v31 = vpop.f32.mrf.mxu0  ;;  %p475_p0 = scmp.ne.s32.totalorder %s397_s16, %s474_s17  ;;  %p479_p1 = scmp.lt.s32.totalorder %s397_s16, %s397_s16 }
  0xd5   :  { %v114_v33 = vadd.f32 %v404_v17, %v113_v31  ;;  %v128_v34 = vpack.c.bf16 %v122_v29, %v119_v30  ;;  %v287_v29 = vlaneseq  ;;  %p480_p2 = scmp.lt.s32.totalorder %s478_s18, %s474_s17 }
  0xd7   :  { %v127_v35 = vpack.c.bf16 %v114_v33, %v111_v32  ;;  %v584_v31 = vshrl.u32 %v287_v29, 7  ;;  %p481_p3 = por %p480_p2, %p479_p1 }
  0xd9   :  { %462 = vtanh.bf16 %v127_v35  ;;  %v289_v33 = vsub.s32 0, %v584_v31  ;;  %p482_p4 = pnand %p481_p3, %p475_p0 }
  0xda   :  { %464 = vtanh.bf16 %v128_v34 }
  0xdf   :  { %v459_v36 = vpop.eup %458 }
  0xe0   :  { %v461_v37 = vpop.eup %460  ;;  %443 = vmatprep.mubr.msk.bf16.mxu1 %vm153_vm1, %v459_v36 }
  0xe1   :  { %444 = vmatmul.mubr.msk.bf16.vlgmr.msra.gmra.mxu1 %vm153_vm1, %v461_v37 }
  0xe7   :  { %v463_v38 = vpop.eup %462 }
  0xe8   :  { %v465_v39 = vpop.eup %464  ;;  %447 = vmatprep.mubr.msk.bf16.mxu1 %vm153_vm1, %v463_v38 }
  0xe9   :  { %448 = vmatmul.mubr.msk.bf16.gmra.mxu1 %vm153_vm1, %v465_v39 }
 0x1a1   :  { %v445_v41 = vpop.f32.mrf.mxu1 }
 0x1a2   :  { %v209_v45 = vadd.f32 %v445_v41, %v410_v42 }
 0x1a3   :  { %v200_v43 = vpop.f32.mrf.mxu1 }
 0x1a4   :  { %v201_v48 = vadd.f32 %v410_v42, %v200_v43 }
 0x1a5   :  { %v446_v44 = vpop.f32.mrf.mxu1 }
 0x1a6   :  { %v212_v46 = vadd.f32 %v446_v44, %v410_v42 }
 0x1a7   :  { %v203_v47 = vpop.f32.mrf.mxu1 }
 0x1a8   :  { %v232_v49 = vpack.c.bf16 %v212_v46, %v209_v45  ;;  %v204_v50 = vadd.f32 %v410_v42, %v203_v47 }
 0x1a9   :  { %v449_v51 = vpop.f32.mrf.mxu1 }
 0x1aa   :  { %466 = vtanh.bf16 %v232_v49  ;;  %v231_v52 = vpack.c.bf16 %v204_v50, %v201_v48  ;;  %v225_v55 = vadd.f32 %v449_v51, %v410_v42  ;;  %v333_v50 = vand.u32 127, %v287_v29 }
 0x1ab   :  { %v216_v53 = vpop.f32.mrf.mxu1 }
 0x1ac   :  { %468 = vtanh.bf16 %v231_v52  ;;  %v217_v58 = vadd.f32 %v410_v42, %v216_v53  ;;  %v338_v51 = vadd.s32 4294967288, %v333_v50 }
 0x1ad   :  { %v450_v54 = vpop.f32.mrf.mxu1 }
 0x1ae   :  { %v228_v56 = vadd.f32 %v450_v54, %v410_v42  ;;  %v341_v53 = vsub.s32 %v338_v51, %v584_v31  ;;  %v345_v54 = vadd.s32 4294967280, %v333_v50 }
 0x1af   :  { %v219_v57 = vpop.f32.mrf.mxu1 }
 0x1b0   :  { %v234_v59 = vpack.c.bf16 %v228_v56, %v225_v55  ;;  %v220_v60 = vadd.f32 %v410_v42, %v219_v57  ;;  %v336_v56 = vsub.s32 %v333_v50, %v584_v31 }
 0x1b2   :  { %470 = vtanh.bf16 %v234_v59  ;;  %v233_v61 = vpack.c.bf16 %v220_v60, %v217_v58  ;;  %v359_v58 = vadd.s32 4294967264, %v333_v50  ;;  %v352_v59 = vadd.s32 4294967272, %v333_v50 }
 0x1b4   :  { %472 = vtanh.bf16 %v233_v61  ;;  %v348_v61 = vsub.s32 %v345_v54, %v584_v31 }
 0x1b8   :  { %v467_v62 = vpop.eup %466 }
 0x1b9   :  { %v241_v0 = vunpack.c.l.bf16 %v467_v62  ;;  %v242_v1 = vunpack.c.h.bf16 %v467_v62 }
 0x1ba   :  { %v469_v2 = vpop.eup %468 }
 0x1bb   :  { %v253_v3 = vmul.f32 %v417_v63, %v241_v0  ;;  %v239_v4 = vunpack.c.l.bf16 %v469_v2  ;;  %v240_v5 = vunpack.c.h.bf16 %v469_v2  ;;  %v254_v8 = vmul.f32 %v417_v63, %v242_v1 }
 0x1bc   :  { %v366_v0 = vadd.s32 4294967256, %v333_v50  ;;  %v362_v1 = vsub.s32 %v359_v58, %v584_v31  ;;  %v355_v2 = vsub.s32 %v352_v59, %v584_v31 }
 0x1bd   :  { %v265_v6 = vsel %vm153_vm1, %v253_v3, 0.0  ;;  %v251_v7 = vmul.f32 %v417_v63, %v239_v4  ;;  %v252_v10 = vmul.f32 %v417_v63, %v240_v5  ;;  %v268_v12 = vsel %vm153_vm1, %v254_v8, 0.0 }
 0x1be   :  { %266 = vadd.xlane.f32.xlu1 %v265_v6  ;;  %v373_v5 = vadd.s32 4294967248, %v333_v50  ;;  %v380_v8 = vadd.s32 4294967240, %v333_v50 }
 0x1bf   :  { %v259_v9 = vsel %vm153_vm1, %v251_v7, 0.0  ;;  %v262_v15 = vsel %vm153_vm1, %v252_v10, 0.0  ;;  %v369_v7 = vsub.s32 %v366_v0, %v584_v31 }
 0x1c0   :  { %v471_v11 = vpop.eup %470  ;;  %260 = vadd.xlane.f32.xlu0 %v259_v9 }
 0x1c1   :  { %v245_v13 = vunpack.c.l.bf16 %v471_v11  ;;  %v246_v23 = vunpack.c.h.bf16 %v471_v11 }
 0x1c2   :  { %v473_v14 = vpop.eup %472  ;;  %269 = vadd.xlane.f32.xlu1 %v268_v12  ;;  %v376_v12 = vsub.s32 %v373_v5, %v584_v31 }
 0x1c3   :  { %v244_v16 = vunpack.c.h.bf16 %v473_v14  ;;  %v257_v17 = vmul.f32 %v417_v63, %v245_v13  ;;  %v243_v18 = vunpack.c.l.bf16 %v473_v14  ;;  %v258_v25 = vmul.f32 %v417_v63, %v246_v23 }
 0x1c4   :  { %263 = vadd.xlane.f32.xlu0 %v262_v15 }
 0x1c5   :  { %v256_v19 = vmul.f32 %v417_v63, %v244_v16  ;;  %v277_v21 = vsel %vm153_vm1, %v257_v17, 0.0  ;;  %v255_v22 = vmul.f32 %v417_v63, %v243_v18  ;;  %v280_v26 = vsel %vm153_vm1, %v258_v25, 0.0 }
 0x1c6   :  { %v383_v16 = vsub.s32 %v380_v8, %v584_v31 }
 0x1c7   :  { %v274_v20 = vsel %vm153_vm1, %v256_v19, 0.0  ;;  %v271_v24 = vsel %vm153_vm1, %v255_v22, 0.0 }
 0x1c8   :  { %275 = vadd.xlane.f32.xlu1 %v274_v20  ;;  %278 = vadd.xlane.f32.xlu0 %v277_v21 }
 0x1cc   :  { %272 = vadd.xlane.f32.xlu0 %v271_v24 }
 0x1d0   :  { %281 = vadd.xlane.f32.xlu0 %v280_v26 }
 0x1d9   :  { %285 = vperm.xlu1 %453, %v22_v27  }
 0x247   :  { %v267_v28 = vpop.xlane.xlu1 %266 }
 0x249   :  { %v261_v34 = vpop.xlane.xlu0 %260 }
 0x24b   :  { %v270_v30 = vpop.xlane.xlu1 %269 }
 0x24d   :  { %v264_v39 = vpop.xlane.xlu0 %263 }
 0x251   :  { %v276_v32 = vpop.xlane.xlu1 %275  ;;  %v279_v42 = vpop.xlane.xlu0 %278 }
 0x255   :  { %v286_v35 = vpop.permute.xlu1 %285  ;;  %v273_v44 = vpop.xlane.xlu0 %272 }
 0x256   :  { %v290_v36 = vrot.slane %v286_v35, %v289_v33 }
 0x258   :  { %v294_v37 = vadd.f32 %v290_v36, %v267_v28  ;;  %v292_v38 = vadd.f32 %v290_v36, %v261_v34  ;;  %v295_v40 = vadd.f32 %v290_v36, %v270_v30  ;;  %v293_v41 = vadd.f32 %v290_v36, %v264_v39 }
 0x259   :  { %v298_v43 = vadd.f32 %v290_v36, %v279_v42  ;;  %v296_v45 = vadd.f32 %v290_v36, %v273_v44  ;;  %v297_v46 = vadd.f32 %v290_v36, %v276_v32  ;;  %v282_v47 = vpop.xlane.xlu0 %281 }
 0x25a   :  { %315 = vperm.xlu1 %453, %v294_v37   ;;  %309 = vperm.xlu0 %454, %v292_v38   ;;  %v299_v48 = vadd.f32 %v290_v36, %v282_v47 }
 0x25e   :  { %318 = vperm.xlu1 %453, %v295_v40  }
 0x262   :  { %312 = vperm.xlu1 %453, %v293_v41  }
 0x266   :  { %327 = vperm.xlu1 %453, %v298_v43  }
 0x26a   :  { %321 = vperm.xlu1 %453, %v296_v45  }
 0x26e   :  { %324 = vperm.xlu1 %453, %v297_v46  }
 0x272   :  { %330 = vperm.xlu1 %453, %v299_v48  }
 0x2d5   :  { %v316_v49 = vpop.permute.xlu1 %315  ;;  %v310_v57 = vpop.permute.xlu0 %309 }
 0x2d6   :  { %v337_v63 = vrot.slane %v310_v57, %v336_v56  ;;  %v349_v4 = vrot.slane %v316_v49, %v348_v61 }
 0x2d9   :  { %v319_v52 = vpop.permute.xlu1 %318 }
 0x2da   :  { %v356_v11 = vrot.slane %v319_v52, %v355_v2 }
 0x2dd   :  { %v313_v55 = vpop.permute.xlu1 %312 }
 0x2de   :  { %v342_v60 = vrot.slane %v313_v55, %v341_v53 }
 0x2e0   :  { %v344_v3 = vsel %vm343_vm2, %v342_v60, %v337_v63 }
 0x2e1   :  { %v328_v62 = vpop.permute.xlu1 %327  ;;  %v351_v9 = vsel %vm350_vm3, %v349_v4, %v344_v3 }
 0x2e2   :  { %v358_v14 = vsel %vm357_vm4, %v356_v11, %v351_v9  ;;  %v377_v19 = vrot.slane %v328_v62, %v376_v12 }
 0x2e5   :  { %v322_v6 = vpop.permute.xlu1 %321 }
 0x2e6   :  { %v363_v10 = vrot.slane %v322_v6, %v362_v1 }
 0x2e8   :  { %v365_v17 = vsel %vm364_vm5, %v363_v10, %v358_v14 }
 0x2e9   :  { %v325_v13 = vpop.permute.xlu1 %324 }
 0x2ea   :  { %v370_v15 = vrot.slane %v325_v13, %v369_v7 }
 0x2ec   :  { %v372_v18 = vsel %vm371_vm6, %v370_v15, %v365_v17 }
 0x2ed   :  { %v331_v20 = vpop.permute.xlu1 %330  ;;  %v379_v22 = vsel %vm378_vm7, %v377_v19, %v372_v18 }
 0x2ee   :  { %v384_v21 = vrot.slane %v331_v20, %v383_v16 }
 0x2f0   :  { %v386_v23 = vsel %vm385_vm8, %v384_v21, %v379_v22 }
 0x2f1   :  { %389 = vst.msk [vmem:[#allocation2] sm:$0x1] %vm388_vm9, %v386_v23 }
 0x2f2   :  { %485 = shalt.err (!%p482_p4)
}
 0x2f3   :  { %399 = dma.vmem_to_hbm [thread:$0]  %s397_s16, 16, %s602_s4, [#allocation3]  }
 0x2f4   :  { %494 = dma.done.wait [#allocation3], 16  }
 0x2f5   :  { %495 = vsyncadd [#allocation3], 4294967280 }
 0x2f6   :  { %403 = vsyncpa [#allocation3], 1 }

// kernel: tpu_custom_call.1
= control target key start
LH: loop header
LB: loop body
LE: loop exit
PB: predicated region body
PF: predicated region fallthrough
CT: control target
= control target key end

     0   :  { %vm47_vm0 = vcmask 130048   ;;  %s598_s0 = inlined_call_operand.vmem [shape: f32[64,16], index: 0, kind: input, shape index: {}]   ;;  %s599_s1 = inlined_call_operand.vmem [shape: bf16[16,32], index: 1, kind: input, shape index: {}]   ;;  %s600_s2 = inlined_call_operand.vmem [shape: bf16[32,32], index: 2, kind: input, shape index: {}]   ;;  %s601_s3 = inlined_call_operand.vmem [shape: f32[4,32], index: 3, kind: input, shape index: {}]   ;;  %s602_s4 = inlined_call_operand.hbm [shape: f32[1,64], index: 4, kind: output, shape index: {}]  }
   0x1   :  { %v455_v0 = vld [vmem:[%s599_s1] sm:$0xff]   ;;  %v24_v2 = vld [vmem:[%s598_s0 + $0x8] sm:$0xff]  ;;  %v25_v3 = vld [vmem:[%s598_s0 + $0x10] sm:$0xff] }
   0x2   :  { %v23_v1 = vld [vmem:[%s598_s0] sm:$0xff]  ;;  %429 = vmatprep.subr.bf16.mxu0 %v455_v0  ;;  %v26_v5 = vld [vmem:[%s598_s0 + $0x18] sm:$0xff]  ;;  %v28_v7 = vld [vmem:[%s598_s0 + $0x28] sm:$0xff] }
   0x3   :  { %v31_v4 = vpack.c.bf16 %v24_v2, %v23_v1  ;;  %v27_v6 = vld [vmem:[%s598_s0 + $0x20] sm:$0xff]  ;;  %430 = vmatpush3.bf16.msra.mxu0 %v455_v0  ;;  %v32_v8 = vpack.c.bf16 %v26_v5, %v25_v3 }
   0x4   :  { %v33_v9 = vpack.c.bf16 %v28_v7, %v27_v6 }
   0x5   :  { %431 = vmatprep.mubr.msk.bf16.mxu0 %vm47_vm0, %v31_v4 }
   0x6   :  { %9 = vsyncpa [#allocation3], 0  ;;  %432 = vmatmul.mubr.msk.bf16.vlgmr.msra.gmra.mxu0 %vm47_vm0, %v32_v8  ;;  %v29_v10 = vld [vmem:[%s598_s0 + $0x30] sm:$0xff]  ;;  %v30_v11 = vld [vmem:[%s598_s0 + $0x38] sm:$0xff]  ;;  %vm153_vm1 = vcmask 261120   ;;  %v496_v40 = vmov 0  }
   0x7   :  { %435 = vmatprep.mubr.msk.bf16.mxu0 %vm47_vm0, %v33_v9  ;;  %v34_v12 = vpack.c.bf16 %v30_v11, %v29_v10  ;;  %v456_v13 = vld [vmem:[%s600_s2 + $0x8] sm:$0xff]   ;;  %v457_v14 = vld [vmem:[%s600_s2] sm:$0xff]   ;;  %453 = vset.pattern.permute.xlu1 %v496_v40  ;;  %vm343_vm2 = vcmask 130112   ;;  %vm350_vm3 = vcmask 195712   ;;  %vm357_vm4 = vcmask 261312  }
   0x8   :  { %439 = vmatprep.subr.bf16.mxu1 %v456_v13  ;;  %v404_v17 = vld [vmem:[%s601_s3] ss:$0 sm:$0xff]  ;;  %454 = vset.pattern.permute.xlu0 %v496_v40  ;;  %v410_v42 = vld [vmem:[%s601_s3 + $0x1] ss:$0 sm:$0xff]  ;;  %v417_v63 = vld [vmem:[%s601_s3 + $0x2] ss:$0 sm:$0xff] }
   0x9   :  { %440 = vmatpush3.bf16.msra.mxu1 %v456_v13  ;;  %vm364_vm5 = vcmask 326912   ;;  %vm371_vm6 = vcmask 392512   ;;  %vm378_vm7 = vcmask 458112   ;;  %vm385_vm8 = vcmask 523712  }
   0xa   :  { %441 = vmatprep.subr.bf16.mxu1 %v457_v14  ;;  %vm388_vm9 = vcmask 516096  }
   0xd   :  { %442 = vmatpush3.bf16.msra.mxu1 %v457_v14 }
   0xe   :  { %436 = vmatmul.mubr.msk.bf16.gmra.mxu0 %vm47_vm0, %v34_v12 }
  0xc6   :  { %v433_v15 = vpop.f32.mrf.mxu0 }
  0xc7   :  { %v103_v20 = vadd.f32 %v433_v15, %v404_v17 }
  0xc8   :  { %v94_v16 = vpop.f32.mrf.mxu0 }
  0xc9   :  { %v95_v22 = vadd.f32 %v404_v17, %v94_v16 }
  0xca   :  { %v434_v18 = vpop.f32.mrf.mxu0 }
  0xcb   :  { %v106_v19 = vadd.f32 %v434_v18, %v404_v17 }
  0xcc   :  { %v97_v21 = vpop.f32.mrf.mxu0 }
  0xcd   :  { %v98_v23 = vadd.f32 %v404_v17, %v97_v21  ;;  %v126_v24 = vpack.c.bf16 %v106_v19, %v103_v20 }
  0xce   :  { %v437_v25 = vpop.f32.mrf.mxu0 }
  0xcf   :  { %v125_v26 = vpack.c.bf16 %v98_v23, %v95_v22  ;;  %v119_v30 = vadd.f32 %v437_v25, %v404_v17 }
  0xd0   :  { %v110_v27 = vpop.f32.mrf.mxu0 }
  0xd1   :  { %458 = vtanh.bf16 %v125_v26  ;;  %v111_v32 = vadd.f32 %v404_v17, %v110_v27  ;;  %v22_v27 = vld [vmem:[%s601_s3 + $0x3] sm:$0x1]  ;;  %s497_s3 = smov [#allocation2]  }
  0xd2   :  { %460 = vtanh.bf16 %v126_v24  ;;  %v438_v28 = vpop.f32.mrf.mxu0  ;;  %s396_s16 = sshll.u32 %s497_s3, 4  ;;  %s397_s16 = int_to_ptr.vmem [resolvable:$true] %s396_s16 }
  0xd3   :  { %v122_v29 = vadd.f32 %v438_v28, %v404_v17  ;;  %s474_s17 = scalar_lea.vmem %s397_s16, 16  ;;  %s478_s18 = scalar_lea.vmem %s397_s16, 32 }
  0xd4   :  { %v113_v31 = vpop.f32.mrf.mxu0  ;;  %p475_p0 = scmp.ne.s32.totalorder %s397_s16, %s474_s17  ;;  %p479_p1 = scmp.lt.s32.totalorder %s397_s16, %s397_s16 }
  0xd5   :  { %v114_v33 = vadd.f32 %v404_v17, %v113_v31  ;;  %v128_v34 = vpack.c.bf16 %v122_v29, %v119_v30  ;;  %v287_v29 = vlaneseq  ;;  %p480_p2 = scmp.lt.s32.totalorder %s478_s18, %s474_s17 }
  0xd7   :  { %v127_v35 = vpack.c.bf16 %v114_v33, %v111_v32  ;;  %v584_v31 = vshrl.u32 %v287_v29, 7  ;;  %p481_p3 = por %p480_p2, %p479_p1 }
  0xd9   :  { %462 = vtanh.bf16 %v127_v35  ;;  %v289_v33 = vsub.s32 0, %v584_v31  ;;  %p482_p4 = pnand %p481_p3, %p475_p0 }
  0xda   :  { %464 = vtanh.bf16 %v128_v34 }
  0xdf   :  { %v459_v36 = vpop.eup %458 }
  0xe0   :  { %v461_v37 = vpop.eup %460  ;;  %443 = vmatprep.mubr.msk.bf16.mxu1 %vm153_vm1, %v459_v36 }
  0xe1   :  { %444 = vmatmul.mubr.msk.bf16.vlgmr.msra.gmra.mxu1 %vm153_vm1, %v461_v37 }
  0xe7   :  { %v463_v38 = vpop.eup %462 }
  0xe8   :  { %v465_v39 = vpop.eup %464  ;;  %447 = vmatprep.mubr.msk.bf16.mxu1 %vm153_vm1, %v463_v38 }
  0xe9   :  { %448 = vmatmul.mubr.msk.bf16.gmra.mxu1 %vm153_vm1, %v465_v39 }
 0x1a1   :  { %v445_v41 = vpop.f32.mrf.mxu1 }
 0x1a2   :  { %v209_v45 = vadd.f32 %v445_v41, %v410_v42 }
 0x1a3   :  { %v200_v43 = vpop.f32.mrf.mxu1 }
 0x1a4   :  { %v201_v48 = vadd.f32 %v410_v42, %v200_v43 }
 0x1a5   :  { %v446_v44 = vpop.f32.mrf.mxu1 }
 0x1a6   :  { %v212_v46 = vadd.f32 %v446_v44, %v410_v42 }
 0x1a7   :  { %v203_v47 = vpop.f32.mrf.mxu1 }
 0x1a8   :  { %v232_v49 = vpack.c.bf16 %v212_v46, %v209_v45  ;;  %v204_v50 = vadd.f32 %v410_v42, %v203_v47 }
 0x1a9   :  { %v449_v51 = vpop.f32.mrf.mxu1 }
 0x1aa   :  { %466 = vtanh.bf16 %v232_v49  ;;  %v231_v52 = vpack.c.bf16 %v204_v50, %v201_v48  ;;  %v225_v55 = vadd.f32 %v449_v51, %v410_v42  ;;  %v333_v50 = vand.u32 127, %v287_v29 }
 0x1ab   :  { %v216_v53 = vpop.f32.mrf.mxu1 }
 0x1ac   :  { %468 = vtanh.bf16 %v231_v52  ;;  %v217_v58 = vadd.f32 %v410_v42, %v216_v53  ;;  %v338_v51 = vadd.s32 4294967288, %v333_v50 }
 0x1ad   :  { %v450_v54 = vpop.f32.mrf.mxu1 }
 0x1ae   :  { %v228_v56 = vadd.f32 %v450_v54, %v410_v42  ;;  %v341_v53 = vsub.s32 %v338_v51, %v584_v31  ;;  %v345_v54 = vadd.s32 4294967280, %v333_v50 }
 0x1af   :  { %v219_v57 = vpop.f32.mrf.mxu1 }
 0x1b0   :  { %v234_v59 = vpack.c.bf16 %v228_v56, %v225_v55  ;;  %v220_v60 = vadd.f32 %v410_v42, %v219_v57  ;;  %v336_v56 = vsub.s32 %v333_v50, %v584_v31 }
 0x1b2   :  { %470 = vtanh.bf16 %v234_v59  ;;  %v233_v61 = vpack.c.bf16 %v220_v60, %v217_v58  ;;  %v359_v58 = vadd.s32 4294967264, %v333_v50  ;;  %v352_v59 = vadd.s32 4294967272, %v333_v50 }
 0x1b4   :  { %472 = vtanh.bf16 %v233_v61  ;;  %v348_v61 = vsub.s32 %v345_v54, %v584_v31 }
 0x1b8   :  { %v467_v62 = vpop.eup %466 }
 0x1b9   :  { %v241_v0 = vunpack.c.l.bf16 %v467_v62  ;;  %v242_v1 = vunpack.c.h.bf16 %v467_v62 }
 0x1ba   :  { %v469_v2 = vpop.eup %468 }
 0x1bb   :  { %v253_v3 = vmul.f32 %v417_v63, %v241_v0  ;;  %v239_v4 = vunpack.c.l.bf16 %v469_v2  ;;  %v240_v5 = vunpack.c.h.bf16 %v469_v2  ;;  %v254_v8 = vmul.f32 %v417_v63, %v242_v1 }
 0x1bc   :  { %v366_v0 = vadd.s32 4294967256, %v333_v50  ;;  %v362_v1 = vsub.s32 %v359_v58, %v584_v31  ;;  %v355_v2 = vsub.s32 %v352_v59, %v584_v31 }
 0x1bd   :  { %v265_v6 = vsel %vm153_vm1, %v253_v3, 0.0  ;;  %v251_v7 = vmul.f32 %v417_v63, %v239_v4  ;;  %v252_v10 = vmul.f32 %v417_v63, %v240_v5  ;;  %v268_v12 = vsel %vm153_vm1, %v254_v8, 0.0 }
 0x1be   :  { %266 = vadd.xlane.f32.xlu1 %v265_v6  ;;  %v373_v5 = vadd.s32 4294967248, %v333_v50  ;;  %v380_v8 = vadd.s32 4294967240, %v333_v50 }
 0x1bf   :  { %v259_v9 = vsel %vm153_vm1, %v251_v7, 0.0  ;;  %v262_v15 = vsel %vm153_vm1, %v252_v10, 0.0  ;;  %v369_v7 = vsub.s32 %v366_v0, %v584_v31 }
 0x1c0   :  { %v471_v11 = vpop.eup %470  ;;  %260 = vadd.xlane.f32.xlu0 %v259_v9 }
 0x1c1   :  { %v245_v13 = vunpack.c.l.bf16 %v471_v11  ;;  %v246_v23 = vunpack.c.h.bf16 %v471_v11 }
 0x1c2   :  { %v473_v14 = vpop.eup %472  ;;  %269 = vadd.xlane.f32.xlu1 %v268_v12  ;;  %v376_v12 = vsub.s32 %v373_v5, %v584_v31 }
 0x1c3   :  { %v244_v16 = vunpack.c.h.bf16 %v473_v14  ;;  %v257_v17 = vmul.f32 %v417_v63, %v245_v13  ;;  %v243_v18 = vunpack.c.l.bf16 %v473_v14  ;;  %v258_v25 = vmul.f32 %v417_v63, %v246_v23 }
 0x1c4   :  { %263 = vadd.xlane.f32.xlu0 %v262_v15 }
 0x1c5   :  { %v256_v19 = vmul.f32 %v417_v63, %v244_v16  ;;  %v277_v21 = vsel %vm153_vm1, %v257_v17, 0.0  ;;  %v255_v22 = vmul.f32 %v417_v63, %v243_v18  ;;  %v280_v26 = vsel %vm153_vm1, %v258_v25, 0.0 }
 0x1c6   :  { %v383_v16 = vsub.s32 %v380_v8, %v584_v31 }
 0x1c7   :  { %v274_v20 = vsel %vm153_vm1, %v256_v19, 0.0  ;;  %v271_v24 = vsel %vm153_vm1, %v255_v22, 0.0 }
 0x1c8   :  { %275 = vadd.xlane.f32.xlu1 %v274_v20  ;;  %278 = vadd.xlane.f32.xlu0 %v277_v21 }
 0x1cc   :  { %272 = vadd.xlane.f32.xlu0 %v271_v24 }
 0x1d0   :  { %281 = vadd.xlane.f32.xlu0 %v280_v26 }
 0x1d9   :  { %285 = vperm.xlu1 %453, %v22_v27  }
 0x247   :  { %v267_v28 = vpop.xlane.xlu1 %266 }
 0x249   :  { %v261_v34 = vpop.xlane.xlu0 %260 }
 0x24b   :  { %v270_v30 = vpop.xlane.xlu1 %269 }
 0x24d   :  { %v264_v39 = vpop.xlane.xlu0 %263 }
 0x251   :  { %v276_v32 = vpop.xlane.xlu1 %275  ;;  %v279_v42 = vpop.xlane.xlu0 %278 }
 0x255   :  { %v286_v35 = vpop.permute.xlu1 %285  ;;  %v273_v44 = vpop.xlane.xlu0 %272 }
 0x256   :  { %v290_v36 = vrot.slane %v286_v35, %v289_v33 }
 0x258   :  { %v294_v37 = vadd.f32 %v290_v36, %v267_v28  ;;  %v292_v38 = vadd.f32 %v290_v36, %v261_v34  ;;  %v295_v40 = vadd.f32 %v290_v36, %v270_v30  ;;  %v293_v41 = vadd.f32 %v290_v36, %v264_v39 }
 0x259   :  { %v298_v43 = vadd.f32 %v290_v36, %v279_v42  ;;  %v296_v45 = vadd.f32 %v290_v36, %v273_v44  ;;  %v297_v46 = vadd.f32 %v290_v36, %v276_v32  ;;  %v282_v47 = vpop.xlane.xlu0 %281 }
 0x25a   :  { %315 = vperm.xlu1 %453, %v294_v37   ;;  %309 = vperm.xlu0 %454, %v292_v38   ;;  %v299_v48 = vadd.f32 %v290_v36, %v282_v47 }
 0x25e   :  { %318 = vperm.xlu1 %453, %v295_v40  }
 0x262   :  { %312 = vperm.xlu1 %453, %v293_v41  }
 0x266   :  { %327 = vperm.xlu1 %453, %v298_v43  }
 0x26a   :  { %321 = vperm.xlu1 %453, %v296_v45  }
 0x26e   :  { %324 = vperm.xlu1 %453, %v297_v46  }
 0x272   :  { %330 = vperm.xlu1 %453, %v299_v48  }
 0x2d5   :  { %v316_v49 = vpop.permute.xlu1 %315  ;;  %v310_v57 = vpop.permute.xlu0 %309 }
 0x2d6   :  { %v337_v63 = vrot.slane %v310_v57, %v336_v56  ;;  %v349_v4 = vrot.slane %v316_v49, %v348_v61 }
 0x2d9   :  { %v319_v52 = vpop.permute.xlu1 %318 }
 0x2da   :  { %v356_v11 = vrot.slane %v319_v52, %v355_v2 }
 0x2dd   :  { %v313_v55 = vpop.permute.xlu1 %312 }
 0x2de   :  { %v342_v60 = vrot.slane %v313_v55, %v341_v53 }
 0x2e0   :  { %v344_v3 = vsel %vm343_vm2, %v342_v60, %v337_v63 }
 0x2e1   :  { %v328_v62 = vpop.permute.xlu1 %327  ;;  %v351_v9 = vsel %vm350_vm3, %v349_v4, %v344_v3 }
 0x2e2   :  { %v358_v14 = vsel %vm357_vm4, %v356_v11, %v351_v9  ;;  %v377_v19 = vrot.slane %v328_v62, %v376_v12 }
 0x2e5   :  { %v322_v6 = vpop.permute.xlu1 %321 }
 0x2e6   :  { %v363_v10 = vrot.slane %v322_v6, %v362_v1 }
 0x2e8   :  { %v365_v17 = vsel %vm364_vm5, %v363_v10, %v358_v14 }
 0x2e9   :  { %v325_v13 = vpop.permute.xlu1 %324 }
 0x2ea   :  { %v370_v15 = vrot.slane %v325_v13, %v369_v7 }
 0x2ec   :  { %v372_v18 = vsel %vm371_vm6, %v370_v15, %v365_v17 }
 0x2ed   :  { %v331_v20 = vpop.permute.xlu1 %330  ;;  %v379_v22 = vsel %vm378_vm7, %v377_v19, %v372_v18 }
 0x2ee   :  { %v384_v21 = vrot.slane %v331_v20, %v383_v16 }
 0x2f0   :  { %v386_v23 = vsel %vm385_vm8, %v384_v21, %v379_v22 }
 0x2f1   :  { %389 = vst.msk [vmem:[#allocation2] sm:$0x1] %vm388_vm9, %v386_v23 }
 0x2f2   :  { %485 = shalt.err (!%p482_p4)
}
 0x2f3   :  { %399 = dma.vmem_to_hbm [thread:$0]  %s397_s16, 16, %s602_s4, [#allocation3]  }
 0x2f4   :  { %494 = dma.done.wait [#allocation3], 16  }
 0x2f5   :  { %495 = vsyncadd [#allocation3], 4294967280 }
 0x2f6   :  { %403 = vsyncpa [#allocation3], 1 }

</bundles_post_ra>
